<compile_context>
chip_gen: v7x
topology: tpu7x:2x2x1
jax: 0.10.0
libtpu: 0.0.40
codegen_flags: <defaults>
</compile_context>

<pallas_src>
import math

import jax
import jax.numpy as jnp
from jax.experimental import pallas as pl
from jax.experimental.pallas import tpu as pltpu


def _rup(a, m):
    return -(-a // m) * m


def _attn_cond_kernel(hp_ref, v_ref, x_ref, out_ref, attn_ref):
    # hp_ref:   (1, TB, TD)      d-th channel slab of hp = h @ Wq + bq
    # v_ref:    (TB, k_dim)      fused score weights v = hp @ Wk^T (resident across d)
    # x_ref:    (TB, k_dim, HW)  feature map, channel-major, spatially flat (resident across d)
    # out_ref:  (TB, TD, HW)
    # attn_ref: (TB, HW) f32     VMEM scratch: softmax attention, computed at d == 0
    d = pl.program_id(1)

    @pl.when(d == 0)
    def _():
        x = x_ref[...].astype(jnp.float32)                   # (TB, k_dim, HW)
        v = v_ref[...].astype(jnp.float32)                   # (TB, k_dim)
        # scores[b, hw] = sum_c v[b, c] * x[b, c, hw]  -- lane-dense VPU MAC + sublane reduce.
        scores = jnp.sum(x * v[:, :, None], axis=1)          # (TB, HW)
        # Softmax over all spatial positions per batch row. HW need not be a multiple
        # of 128: the block spans the full logical extent, so the compiler masks the
        # lane tail in the reductions.
        m = jnp.max(scores, axis=-1, keepdims=True)
        p = jnp.exp(scores - m)
        denom = jnp.sum(p, axis=-1, keepdims=True)
        attn_ref[...] = p * pl.reciprocal(denom, approx=False)

    hp = hp_ref[0].astype(jnp.float32)                       # (TB, TD)
    out = hp[:, :, None] * attn_ref[...][:, None, :]         # (TB, TD, HW)
    # TODO(synk): for very large HW (>= ~4K) chunk this product over smaller slabs in a
    # fori_loop to bound vreg live ranges; only matters at extreme spatial sizes.
    out_ref[...] = out.astype(out_ref.dtype)


def global_attn_cond_net(h, x, wq, bq, wk, bk, *, td=None):
    """h: (B, q_dim); x: (B, k_dim, H, W) NCHW (like torch).

    wq: (q_dim, out_dim), bq: (out_dim,)   -- Linear weight stored transposed.
    wk: (k_dim, out_dim), bk: (out_dim,)   -- 1x1-conv weight, flattened + transposed.
    td: optional override of the out_dim tile (testing / tuning); must divide out_dim.

    Returns out: (B, out_dim, H, W) in promote_types(h.dtype, x.dtype),
    matching GlobalAttnCondNet.forward.
    """
    B, q_dim = h.shape
    _, k_dim, H, W = x.shape
    out_dim = wq.shape[1]
    HW = H * W

    # Explicit I/O dtype policy: promoted input dtype (bf16 inputs -> bf16 out stream;
    # all score/softmax math is f32 inside the kernel regardless).
    io_dtype = jnp.promote_types(h.dtype, x.dtype)
    f32 = jnp.float32

    # --- Hoisted projections: tiny batched matmuls, weights never enter the kernel.
    hp = jnp.dot(h.astype(f32), wq.astype(f32), preferred_element_type=f32) + bq.astype(f32)
    # Fused score weights: scores = x^T (Wk^T hp) = x^T v. bk is intentionally dropped:
    # softmax is shift-invariant, hp . bk only adds a per-batch constant to the logits.
    v = jnp.dot(hp, wk.astype(f32).T, preferred_element_type=f32)
    hp = hp.astype(io_dtype)
    v = v.astype(io_dtype)

    # --- x consumed in its native channel-major layout, spatially flat. NO padding and
    #     NO output slice: x and out are streamed through HBM exactly once.
    x_flat = x.reshape(B, k_dim, HW)

    # --- Per-generation VMEM budget (leave headroom for Mosaic internal scratch):
    #     ~48 MiB on v7x (64 MiB physical), ~96 MiB on v5e/v6e (128 MiB physical).
    try:
        vmem_cap = int(getattr(pltpu.get_tpu_info(), "vmem_capacity_bytes", 64 << 20))
    except Exception:
        vmem_cap = 64 << 20
    vmem_budget = min(vmem_cap * 3 // 4, 100 << 20)

    x_isz = jnp.dtype(x.dtype).itemsize
    io_isz = jnp.dtype(io_dtype).itemsize
    hw_lanes = _rup(HW, 128)

    def tile_bytes(tb, td_):
        # Double-buffered tiles, with (8,128) layout padding accounted for.
        x_blk = tb * _rup(k_dim, 8) * hw_lanes * x_isz
        out_blk = tb * _rup(td_, 8) * hw_lanes * io_isz
        hp_blk = _rup(tb, 8) * _rup(td_, 128) * io_isz
        v_blk = _rup(tb, 8) * _rup(k_dim, 128) * io_isz
        attn_blk = _rup(tb, 8) * hw_lanes * 4
        return 2 * (x_blk + out_blk + hp_blk + v_blk) + attn_blk + (2 << 20)

    # --- Batch tile TB. The 2-D v block requires TB % 8 == 0 or TB == batch extent:
    #     B <= 8 -> one full-batch block; B > 8 -> multiple of 8 sized for ~8 MiB of
    #     x+out per grid step, capped below B so the "parallel" axis has >= 2 steps.
    if B <= 8:
        tb_cands = [B]
        # TODO(synk): for B <= 8 the grid has a single parallel step, leaving one v7x
        # TensorCore idle on tiny-batch invocations.
    else:
        row = _rup(k_dim, 8) * hw_lanes * x_isz + _rup(out_dim, 8) * hw_lanes * io_isz
        tb_hi = ((8 << 20) // max(row, 1)) // 8 * 8
        tb_hi = max(8, min(tb_hi, 8 * ((B - 1) // 8)))
        tb_cands = list(range(tb_hi, 7, -8))

    # --- out_dim tile TD: full out_dim if it fits the VMEM budget, else the largest
    #     multiple-of-8 divisor that does (x stays resident across the d axis).
    if td is not None:
        assert out_dim % td == 0 and (td % 8 == 0 or td == out_dim)
        td_cands = [td]
    else:
        td_cands = [out_dim] + [t for t in range((out_dim // 8) * 8, 7, -8)
                                if t != out_dim and out_dim % t == 0]

    TB = TD = None
    for td_ in td_cands:
        for tb_ in tb_cands:
            if tile_bytes(tb_, td_) <= vmem_budget:
                TB, TD = tb_, td_
                break
        if TB is not None:
            break
    if TB is None:
        # TODO(synk): extreme HW*k_dim would need an HW grid axis + online softmax.
        TB, TD = tb_cands[-1], td_cands[-1]

    n_b = -(-B // TB)
    n_d = out_dim // TD
    B_pad = n_b * TB

    # Only the tiny hp / v are padded (defined data for the ragged batch tail); x and
    # out keep their true batch extent (edge-block writes are masked by Pallas and the
    # garbage rows read from the x edge block are row-isolated).
    if B_pad != B:
        hp = jnp.pad(hp, ((0, B_pad - B), (0, 0)))
        v = jnp.pad(v, ((0, B_pad - B), (0, 0)))
    # hp presented d-major so each (b, d) step gets its (TB, TD) slab via the BlockSpec
    # (no in-kernel dynamic lane slicing): (n_d, B_pad, TD).
    hp_blocks = hp.reshape(B_pad, n_d, TD).transpose(1, 0, 2)

    vmem_limit = int(min(vmem_budget, max(tile_bytes(TB, TD), 32 << 20)))

    out_flat = pl.pallas_call(
        _attn_cond_kernel,
        out_shape=jax.ShapeDtypeStruct((B, out_dim, HW), io_dtype),
        grid_spec=pltpu.PrefetchScalarGridSpec(
            num_scalar_prefetch=0,
            grid=(n_b, n_d),
            in_specs=[
                pl.BlockSpec((1, TB, TD), lambda b, d: (d, b, 0)),        # hp slab
                pl.BlockSpec((TB, k_dim), lambda b, d: (b, 0)),           # v (resident over d)
                pl.BlockSpec((TB, k_dim, HW), lambda b, d: (b, 0, 0)),    # x (resident over d)
            ],
            out_specs=pl.BlockSpec((TB, TD, HW), lambda b, d: (b, d, 0)),
            scratch_shapes=[pltpu.VMEM((TB, HW), jnp.float32)],
        ),
        compiler_params=pltpu.CompilerParams(
            dimension_semantics=("parallel", "arbitrary"),
            vmem_limit_bytes=vmem_limit,
        ),
    )(hp_blocks, v, x_flat)

    return out_flat.reshape(B, out_dim, H, W)


def _xavier_uniform(key, fan_in, fan_out, shape):
    a = math.sqrt(6.0 / (fan_in + fan_out))
    return jax.random.uniform(key, shape, jnp.float32, minval=-a, maxval=a)


def _reference(h, x, wq, bq, wk, bk):
    """Pure-JAX reference mirroring the PyTorch forward (includes bk)."""
    B = h.shape[0]
    hp = h @ wq + bq                                          # (B, out_dim)
    key = jnp.einsum("bchw,co->bohw", x, wk) + bk[None, :, None, None]
    attn = jnp.einsum("bd,bdhw->bhw", hp, key)
    attn = jax.nn.softmax(attn.reshape(B, -1), axis=-1).reshape(attn.shape)
    return hp[:, :, None, None] * attn[:, None, :, :]


def _run_case(seed, B, q_dim, k_dim, out_dim, H, W, td=None):
    root = jax.random.PRNGKey(seed)
    k_h, k_x, k_wq, k_wk, k_bq, k_bk = jax.random.split(root, 6)

    h = jax.random.normal(k_h, (B, q_dim), jnp.float32)
    x = jax.random.normal(k_x, (B, k_dim, H, W), jnp.float32)

    # Xavier-uniform weights (as in reset_parameters). Nonzero biases exercise the
    # general parameter path; the kernel's bk-drop relies on softmax shift-invariance.
    wq = _xavier_uniform(k_wq, q_dim, out_dim, (q_dim, out_dim))
    wk = _xavier_uniform(k_wk, k_dim, out_dim, (k_dim, out_dim))
    bq = 0.1 * jax.random.normal(k_bq, (out_dim,), jnp.float32)
    bk = 0.1 * jax.random.normal(k_bk, (out_dim,), jnp.float32)

    out = jax.block_until_ready(global_attn_cond_net(h, x, wq, bq, wk, bk, td=td))
    ref = _reference(h, x, wq, bq, wk, bk)
    assert out.shape == (B, out_dim, H, W)
    assert jnp.allclose(out, ref, atol=1e-5, rtol=1e-4), "mismatch vs reference"


if __name__ == "__main__":
    # Primary small case (matches the module's intended scale).
    _run_case(0, B=2, q_dim=8, k_dim=4, out_dim=16, H=16, W=16)
    # Ragged / tiled paths: batch not a multiple of TB, HW not a multiple of 128, and a
    # forced out_dim split (exercises the d grid axis + VMEM attn-scratch reuse).
    _run_case(0, B=10, q_dim=8, k_dim=4, out_dim=16, H=12, W=12, td=8)
    print("KERNEL_OK")
</pallas_src>

<mosaic_0001>
module attributes {stable_mosaic.version = 11 : i64} {
  func.func @_attn_cond_kernel(%arg0: i32, %arg1: i32, %arg2: memref<1x2x16xf32, #tpu.memory_space<vmem>>, %arg3: memref<2x4xf32, #tpu.memory_space<vmem>>, %arg4: memref<2x4x256xf32, #tpu.memory_space<vmem>>, %arg5: memref<2x16x256xf32, #tpu.memory_space<vmem>>, %arg6: memref<2x256xf32, #tpu.memory_space<vmem>>) attributes {dimension_semantics = [#tpu.dimension_semantics<parallel>, #tpu.dimension_semantics<arbitrary>], iteration_bounds = array<i64: 1, 1>, scalar_prefetch = 0 : i64, scratch_operands = 1 : i64, tpu.core_type = #tpu.core_type<tc>, window_params = [{transform_indices = @transform_0, window_bounds = array<i64: 1, 2, 16>}, {transform_indices = @transform_1, window_bounds = array<i64: 2, 4>}, {transform_indices = @transform_2, window_bounds = array<i64: 2, 4, 256>}, {transform_indices = @transform_3, window_bounds = array<i64: 2, 16, 256>}]} {
    %c0_i32 = arith.constant 0 : i32
    %0 = arith.cmpi eq, %arg1, %c0_i32 : i32
    %1 = arith.extui %0 : i1 to i32
    %c0_i32_0 = arith.constant 0 : i32
    %2 = arith.cmpi ne, %1, %c0_i32_0 : i32
    scf.if %2 {
      %c0_8 = arith.constant 0 : index
      %c0_9 = arith.constant 0 : index
      %c0_10 = arith.constant 0 : index
      %12 = vector.load %arg4[%c0_8, %c0_9, %c0_10] : memref<2x4x256xf32, #tpu.memory_space<vmem>>, vector<2x4x256xf32>
      %c0_11 = arith.constant 0 : index
      %c0_12 = arith.constant 0 : index
      %13 = vector.load %arg3[%c0_11, %c0_12] : memref<2x4xf32, #tpu.memory_space<vmem>>, vector<2x4xf32>
      %14 = vector.shape_cast %13 : vector<2x4xf32> to vector<2x4x1xf32>
      %15 = vector.broadcast %14 : vector<2x4x1xf32> to vector<2x4x256xf32>
      %16 = arith.mulf %12, %15 : vector<2x4x256xf32>
      %cst = arith.constant dense<0.000000e+00> : vector<2x256xf32>
      %17 = vector.multi_reduction <add>, %16, %cst [1] : vector<2x4x256xf32> to vector<2x256xf32>
      %cst_13 = arith.constant dense<0xFF800000> : vector<2xf32>
      %18 = vector.multi_reduction <maximumf>, %17, %cst_13 [1] : vector<2x256xf32> to vector<2xf32>
      %19 = vector.shape_cast %18 : vector<2xf32> to vector<2x1xf32>
      %20 = vector.broadcast %19 : vector<2x1xf32> to vector<2x256xf32>
      %21 = arith.subf %17, %20 : vector<2x256xf32>
      %22 = math.exp %21 : vector<2x256xf32>
      %cst_14 = arith.constant dense<0.000000e+00> : vector<2xf32>
      %23 = vector.multi_reduction <add>, %22, %cst_14 [1] : vector<2x256xf32> to vector<2xf32>
      %24 = vector.shape_cast %23 : vector<2xf32> to vector<2x1xf32>
      %25 = tpu.reciprocal %24 : vector<2x1xf32> -> vector<2x1xf32>
      %26 = vector.broadcast %25 : vector<2x1xf32> to vector<2x256xf32>
      %27 = arith.mulf %22, %26 : vector<2x256xf32>
      %c0_15 = arith.constant 0 : index
      %c0_16 = arith.constant 0 : index
      %28 = vector.load %arg6[%c0_15, %c0_16] : memref<2x256xf32, #tpu.memory_space<vmem>>, vector<2x256xf32>
      tpu.vector_store %arg6[%c0_15, %c0_16], %27 {strides = array<i32>} : memref<2x256xf32, #tpu.memory_space<vmem>>, vector<2x256xf32>,
    } else {
    }
    %c0 = arith.constant 0 : index
    %c0_1 = arith.constant 0 : index
    %c0_2 = arith.constant 0 : index
    %3 = vector.load %arg2[%c0, %c0_1, %c0_2] : memref<1x2x16xf32, #tpu.memory_space<vmem>>, vector<1x2x16xf32>
    %4 = vector.shape_cast %3 : vector<1x2x16xf32> to vector<2x16xf32>
    %5 = vector.shape_cast %4 : vector<2x16xf32> to vector<2x16x1xf32>
    %c0_3 = arith.constant 0 : index
    %c0_4 = arith.constant 0 : index
    %6 = vector.load %arg6[%c0_3, %c0_4] : memref<2x256xf32, #tpu.memory_space<vmem>>, vector<2x256xf32>
    %7 = vector.shape_cast %6 : vector<2x256xf32> to vector<2x1x256xf32>
    %8 = vector.broadcast %5 : vector<2x16x1xf32> to vector<2x16x256xf32>
    %9 = vector.broadcast %7 : vector<2x1x256xf32> to vector<2x16x256xf32>
    %10 = arith.mulf %8, %9 : vector<2x16x256xf32>
    %c0_5 = arith.constant 0 : index
    %c0_6 = arith.constant 0 : index
    %c0_7 = arith.constant 0 : index
    %11 = vector.load %arg5[%c0_5, %c0_6, %c0_7] : memref<2x16x256xf32, #tpu.memory_space<vmem>>, vector<2x16x256xf32>
    tpu.vector_store %arg5[%c0_5, %c0_6, %c0_7], %10 {strides = array<i32>} : memref<2x16x256xf32, #tpu.memory_space<vmem>>, vector<2x16x256xf32>,
    return
  }
  func.func @transform_0(%arg0: i32, %arg1: i32) -> (i32, i32, i32) {
    %c0_i32 = arith.constant 0 : i32
    %c0_i32_0 = arith.constant 0 : i32
    return %arg1, %arg0, %c0_i32 : i32, i32, i32
  }
  func.func @transform_1(%arg0: i32, %arg1: i32) -> (i32, i32) {
    %c0_i32 = arith.constant 0 : i32
    %c0_i32_0 = arith.constant 0 : i32
    return %arg0, %c0_i32 : i32, i32
  }
  func.func @transform_2(%arg0: i32, %arg1: i32) -> (i32, i32, i32) {
    %c0_i32 = arith.constant 0 : i32
    %c0_i32_0 = arith.constant 0 : i32
    %c0_i32_1 = arith.constant 0 : i32
    return %arg0, %c0_i32, %c0_i32_0 : i32, i32, i32
  }
  func.func @transform_3(%arg0: i32, %arg1: i32) -> (i32, i32, i32) {
    %c0_i32 = arith.constant 0 : i32
    %c0_i32_0 = arith.constant 0 : i32
    return %arg0, %arg1, %c0_i32 : i32, i32, i32
  }
}

</mosaic_0001>

<bundles_post_ra>
// kernel: tpu_custom_call.1
= control target key start
LH: loop header
LB: loop body
LE: loop exit
PB: predicated region body
PF: predicated region fallthrough
CT: control target
= control target key end

     0   :  { %8 = vsyncpa [#allocation4], 0  ;;  %s491_s0 = inlined_call_operand.hbm [shape: f32[1,2,16], index: 0, kind: input, shape index: {}]   ;;  %s492_s1 = inlined_call_operand.vmem [shape: f32[2,4], index: 1, kind: input, shape index: {}]   ;;  %s493_s2 = inlined_call_operand.hbm [shape: f32[2,4,256], index: 2, kind: input, shape index: {}]   ;;  %s494_s3 = inlined_call_operand.hbm [shape: f32[2,16,256], index: 3, kind: output, shape index: {}]  }
   0x1   :  { %9 = vsyncpa [#allocation7], 0 }
   0x2   :  { %10 = vsyncpa [#allocation5], 0  ;;  %s385_s12 = smov [#allocation3]   ;;  %s386_s14 = smov [#allocation6]  }
   0x3   :  { %s17_s13 = sshll.u32 %s385_s12, 4  ;;  %s28_s15 = sshll.u32 %s386_s14, 4  ;;  %s18_s13 = int_to_ptr.vmem [resolvable:$true] %s17_s13  ;;  %s414_s15 = int_to_ptr.vmem [resolvable:$true] %s28_s15 }
   0x4   :  { %s313_s18 = scalar_lea.hbm %s491_s0, 32 }
   0x5   :  { %p314_p0 = scmp.ne.s32.totalorder %s491_s0, %s313_s18  ;;  %p317_p1 = scmp.lt.u32.totalorder %s313_s18, %s491_s0 }
   0x7   :  { %p319_p2 = pnand %p317_p1, %p314_p0 }
   0x9   :  { %322 = shalt.err (!%p319_p2)
}
   0xa   :  { %s323_s23 = scalar_lea.vmem %s18_s13, 32  ;;  %p328_p4 = scmp.lt.s32.totalorder %s18_s13, %s18_s13 }
   0xb   :  { %p324_p3 = scmp.ne.s32.totalorder %s18_s13, %s323_s23  ;;  %p329_p5 = scmp.lt.s32.totalorder %s323_s23, %s323_s23 }
   0xd   :  { %p330_p6 = por %p329_p5, %p328_p4 }
   0xf   :  { %p331_p7 = pnand %p330_p6, %p324_p3 }
  0x11   :  { %334 = shalt.err (!%p331_p7)
}
  0x12   :  { %20 = dma.hbm_to_vmem [thread:$0]  %s491_s0, 32, %s18_s13, [#allocation4]  }
  0x13   :  { %s335_s28 = scalar_lea.hbm %s493_s2, 256 }
  0x14   :  { %p336_p8 = scmp.ne.s32.totalorder %s493_s2, %s335_s28  ;;  %p339_p9 = scmp.lt.u32.totalorder %s335_s28, %s493_s2 }
  0x16   :  { %p341_p10 = pnand %p339_p9, %p336_p8 }
  0x18   :  { %344 = shalt.err (!%p341_p10)
}
  0x19   :  { %s345_s6 = scalar_lea.vmem %s414_s15, 256  ;;  %p350_p12 = scmp.lt.s32.totalorder %s414_s15, %s414_s15 }
  0x1a   :  { %p346_p11 = scmp.ne.s32.totalorder %s414_s15, %s345_s6  ;;  %p351_p13 = scmp.lt.s32.totalorder %s345_s6, %s345_s6 }
  0x1c   :  { %p352_p0 = por %p351_p13, %p350_p12 }
  0x1e   :  { %p353_p1 = pnand %p352_p0, %p346_p11 }
  0x20   :  { %356 = shalt.err (!%p353_p1)
}
  0x21   :  { %s387_s0 = smov 128   ;;  %s388_s7 = smov 8  }
  0x22   :  { %34 = dma.hbm_to_vmem [thread:$0]  %s493_s2, 256, %s414_s15, [#allocation7], %s387_s0, %s387_s0, %s388_s7  }
  0x23   :  { %379 = dma.done.wait [#allocation4], 32  }
  0x24   :  { %380 = vsyncadd [#allocation4], 4294967264 }
  0x25   :  { %381 = dma.done.wait [#allocation7], 256  }
  0x26   :  { %382 = vsyncadd [#allocation7], 4294967040  ;;  %v48_v0 = vlaneseq  ;;  %v47_v4 = vld [vmem:[%s492_s1] sm:$0x3]  ;;  %v389_v7 = vmov 839922192  }
  0x27   :  { %v65_v8 = vunpack.c.l.s4 %v389_v7  ;;  %v45_v12 = vld [vmem:[#allocation6] sm:$0xff]  ;;  %vm88_vm0 = vcmask 1043456   ;;  %v46_v16 = vld [vmem:[#allocation6 + $0x8] sm:$0xff]  ;;  %vm121_vm1 = vcmask 1041409   ;;  %vm126_vm2 = vcmask 1041408   ;;  %s391_s1 = smov [#allocation8]  }
  0x28   :  { %v445_v1 = vshrl.u32 %v48_v0, 7  ;;  %v206_v54 = vld [vmem:[#allocation3] sm:$0x3]  ;;  %vm198_vm3 = vcmask 1043459   ;;  %vm200_vm4 = vcmask 1045509   ;;  %vm202_vm5 = vcmask 1047559  }
  0x29   :  { %v66_v9 = vunpack.c.0.s8 %v65_v8  ;;  %s280_s2 = sshll.u32 %s391_s1, 4  ;;  %s281_s2 = int_to_ptr.vmem [resolvable:$true] %s280_s2 }
  0x2a   :  { %v448_v2 = vsub.s32 0, %v445_v1  ;;  %v451_v3 = vsub.s32 1, %v445_v1  ;;  %s357_s12 = scalar_lea.vmem %s281_s2, 1024  ;;  %p362_p3 = scmp.lt.s32.totalorder %s281_s2, %s281_s2 }
  0x2b   :  { %v69_v10 = vsub.s32 %v66_v9, %v445_v1  ;;  %p358_p2 = scmp.ne.s32.totalorder %s281_s2, %s357_s12  ;;  %p363_p4 = scmp.lt.s32.totalorder %s357_s12, %s357_s12 }
  0x2c   :  { %v51_v5 = vrot.slane %v47_v4, %v448_v2  ;;  %v58_v6 = vrot.slane %v47_v4, %v451_v3  ;;  %v210_v55 = vrot.slane %v206_v54, %v448_v2  ;;  %v221_v56 = vrot.slane %v206_v54, %v451_v3 }
  0x2d   :  { %p364_p5 = por %p363_p4, %p362_p3 }
  0x2e   :  { %53 = vbcast.lane.b32.xlu0 %v51_v5, 256 }
  0x2f   :  { %p365_p6 = pnand %p364_p5, %p358_p2 }
  0x32   :  { %60 = vbcast.lane.b32.xlu0 %v58_v6, 256 }
  0x36   :  { %212 = vbcast.lane.b32.xlu0 %v210_v55, 256 }
  0x3a   :  { %223 = vbcast.lane.b32.xlu0 %v221_v56, 256 }
  0x3e   :  { %227 = vbcast.lane.b32.xlu0 %v221_v56, 264 }
  0xa0   :  { %v54_v11 = vpop.permute.xlu0 %53 }
  0xa1   :  { %v70_v13 = vrot.slane %v54_v11, %v69_v10 }
  0xa3   :  { %v80_v14 = vmul.f32 %v70_v13, %v45_v12 }
  0xa4   :  { %v61_v15 = vpop.permute.xlu0 %60 }
  0xa5   :  { %v84_v17 = vcombine.high %v80_v14, %v80_v14  ;;  %v89_v18 = vsel %vm88_vm0, %v80_v14, 0.0  ;;  %v77_v19 = vrot.slane %v61_v15, %v69_v10 }
  0xa6   :  { %v90_v20 = vrot.slane %v89_v18, 4 }
  0xa7   :  { %v96_v21 = vsel %vm88_vm0, %v84_v17, 0.0  ;;  %v81_v22 = vmul.f32 %v77_v19, %v46_v16 }
  0xa8   :  { %v91_v23 = vadd.f32 %v90_v20, %v89_v18  ;;  %v97_v24 = vrot.slane %v96_v21, 4  ;;  %v390_v18 = vmov 1983009808  }
  0xa9   :  { %v85_v25 = vcombine.high %v81_v22, %v81_v22  ;;  %v103_v26 = vsel %vm88_vm0, %v81_v22, 0.0  ;;  %v178_v19 = vunpack.c.l.s4 %v390_v18 }
  0xaa   :  { %v92_v27 = vrot.slane %v91_v23, 2  ;;  %v98_v28 = vadd.f32 %v97_v24, %v96_v21  ;;  %v104_v29 = vrot.slane %v103_v26, 4 }
  0xab   :  { %v110_v30 = vsel %vm88_vm0, %v85_v25, 0.0  ;;  %v179_v21 = vunpack.c.0.s8 %v178_v19 }
  0xac   :  { %v93_v31 = vadd.f32 %v92_v27, %v91_v23  ;;  %v99_v32 = vrot.slane %v98_v28, 2  ;;  %v105_v33 = vadd.f32 %v104_v29, %v103_v26  ;;  %v111_v34 = vrot.slane %v110_v30, 4 }
  0xad   :  { %v182_v27 = vsub.s32 %v179_v21, %v445_v1 }
  0xae   :  { %v106_v35 = vrot.slane %v105_v33, 2  ;;  %v112_v36 = vadd.f32 %v111_v34, %v110_v30  ;;  %v100_v37 = vadd.f32 %v99_v32, %v98_v28  ;;  %v94_v40 = vrot.slane %v93_v31, 1 }
  0xb0   :  { %v107_v38 = vadd.f32 %v106_v35, %v105_v33  ;;  %v113_v39 = vrot.slane %v112_v36, 2  ;;  %v101_v41 = vrot.slane %v100_v37, 1  ;;  %v95_v44 = vadd.f32 %v94_v40, %v93_v31  ;;  %v213_v35 = vpop.permute.xlu0 %212 }
  0xb2   :  { %v108_v42 = vrot.slane %v107_v38, 1  ;;  %v114_v43 = vadd.f32 %v113_v39, %v112_v36  ;;  %v102_v47 = vadd.f32 %v101_v41, %v100_v37 }
  0xb4   :  { %v109_v45 = vadd.f32 %v108_v42, %v107_v38  ;;  %v115_v46 = vrot.slane %v114_v43, 1  ;;  %v224_v38 = vpop.permute.xlu0 %223 }
  0xb6   :  { %v116_v48 = vadd.f32 %v115_v46, %v114_v43  ;;  %v122_v49 = vsel %vm121_vm1, %v109_v45, %v95_v44 }
  0xb7   :  { %v127_v51 = vsel %vm126_vm2, %v122_v49, -inf }
  0xb8   :  { %v123_v50 = vsel %vm121_vm1, %v116_v48, %v102_v47  ;;  %v228_v43 = vpop.permute.xlu0 %227 }
  0xb9   :  { %v128_v52 = vsel %vm126_vm2, %v123_v50, -inf }
  0xba   :  { %v129_v53 = vmax.f32 %v127_v51, %v128_v52 }
  0xbc   :  { %130 = vmax.xlane.f32.xlu1 %v129_v53 }
 0x149   :  { %v131_v57 = vpop.xlane.xlu1 %130 }
 0x14a   :  { %v133_v58 = vrot.slane %v131_v57, 1  ;;  %v136_v59 = vsub.f32 %v95_v44, %v131_v57  ;;  %v137_v60 = vsub.f32 %v102_v47, %v131_v57 }
 0x14c   :  { %v138_v61 = vsub.f32 %v109_v45, %v133_v58  ;;  %v139_v62 = vsub.f32 %v116_v48, %v133_v58  ;;  %v140_v63 = vmul.f32 1.442695, %v136_v59  ;;  %v142_v5 = vmul.f32 1.442695, %v137_v60 }
 0x14e   :  { %v144_v0 = vmul.f32 1.442695, %v138_v61  ;;  %v146_v4 = vmul.f32 1.442695, %v139_v62 }
 0x150   :  { %303 = vpow2.f32 %v144_v0 }
 0x151   :  { %305 = vpow2.f32 %v146_v4 }
 0x152   :  { %307 = vpow2.f32 %v140_v63 }
 0x153   :  { %309 = vpow2.f32 %v142_v5 }
 0x15a   :  { %v304_v6 = vpop.eup %303 }
 0x15b   :  { %v306_v7 = vpop.eup %305  ;;  %v152_v8 = vrot.slane %v304_v6, 7 }
 0x15c   :  { %v308_v9 = vpop.eup %307  ;;  %v154_v10 = vrot.slane %v306_v7, 7 }
 0x15d   :  { %v310_v11 = vpop.eup %309  ;;  %v153_v12 = vsel %vm121_vm1, %v152_v8, %v308_v9 }
 0x15e   :  { %v155_v13 = vsel %vm121_vm1, %v154_v10, %v310_v11  ;;  %v158_v14 = vsel %vm126_vm2, %v153_v12, 0.0 }
 0x15f   :  { %v159_v15 = vsel %vm126_vm2, %v155_v13, 0.0 }
 0x160   :  { %v160_v16 = vadd.f32 %v159_v15, %v158_v14 }
 0x162   :  { %161 = vadd.xlane.f32.xlu1 %v160_v16 }
 0x173   :  { %216 = vbcast.lane.b32.xlu1 %v210_v55, 264 }
 0x1ef   :  { %v162_v17 = vpop.xlane.xlu1 %161 }
 0x1f0   :  { %311 = vrcp.f32 %v162_v17 }
 0x1f3   :  { %v217_v42 = vpop.permute.xlu1 %216 }
 0x1fa   :  { %v312_v20 = vpop.eup %311 }
 0x1fb   :  { %v165_v22 = vrot.slane %v312_v20, 1  ;;  %v168_v23 = vmul.f32 %v312_v20, %v308_v9  ;;  %v169_v24 = vmul.f32 %v312_v20, %v310_v11 }
 0x1fd   :  { %v170_v25 = vmul.f32 %v304_v6, %v165_v22  ;;  %v171_v26 = vmul.f32 %v306_v7, %v165_v22  ;;  %v176_v28 = vcombine.low %v168_v23, %v169_v24 }
 0x1ff   :  { %v184_v29 = vcombine.low %v170_v25, %v171_v26  ;;  %v183_v31 = vrot.slane %v176_v28, %v182_v27 }
 0x201   :  { %v191_v30 = vrot.slane %v184_v29, %v182_v27 }
 0x203   :  { %v196_v32 = vrot.slane %v191_v30, 7 }
 0x205   :  { %v197_v33 = vsel %vm121_vm1, %v196_v32, %v183_v31 }
 0x206   :  { %v199_v34 = vsel %vm198_vm3, %v196_v32, %v197_v33 }
 0x207   :  { %v201_v36 = vsel %vm200_vm4, %v196_v32, %v199_v34 }
 0x208   :  { %v203_v37 = vsel %vm202_vm5, %v196_v32, %v201_v36 }
 0x209   :  { %205 = vst [vmem:[#allocation2] sm:$0xf] %v203_v37 }
 0x210   :  { %v293_v39 = vld.sshfl [vmem:[#allocation2] sm:$0x33 pattern:$0x75316420] }
 0x211   :  { %v242_v40 = vrot.slane %v293_v39, %v448_v2  ;;  %v246_v1 = vrot.slane %v293_v39, %v451_v3  ;;  %v238_v41 = vcombine.high %v293_v39, %v293_v39 }
 0x213   :  { %v259_v44 = vmul.f32 %v242_v40, %v213_v35  ;;  %v260_v45 = vmul.f32 %v246_v1, %v213_v35  ;;  %v250_v46 = vrot.slane %v238_v41, %v448_v2  ;;  %v254_v47 = vrot.slane %v238_v41, %v451_v3 }
 0x214   :  { %v261_v48 = vmul.f32 %v242_v40, %v217_v42  ;;  %v262_v49 = vmul.f32 %v246_v1, %v217_v42 }
 0x215   :  { %267 = vst [vmem:[#allocation8] sm:$0xff] %v259_v44  ;;  %268 = vst [vmem:[#allocation8 + $0x8] sm:$0xff] %v260_v45  ;;  %v263_v50 = vmul.f32 %v250_v46, %v224_v38  ;;  %v264_v51 = vmul.f32 %v254_v47, %v224_v38  ;;  %v265_v52 = vmul.f32 %v250_v46, %v228_v43 }
 0x216   :  { %v266_v53 = vmul.f32 %v254_v47, %v228_v43  ;;  %269 = vst [vmem:[#allocation8 + $0x10] sm:$0xff] %v261_v48  ;;  %270 = vst [vmem:[#allocation8 + $0x18] sm:$0xff] %v262_v49 }
 0x217   :  { %271 = vst [vmem:[#allocation8 + $0x20] sm:$0xff] %v263_v50  ;;  %272 = vst [vmem:[#allocation8 + $0x28] sm:$0xff] %v264_v51 }
 0x218   :  { %273 = vst [vmem:[#allocation8 + $0x30] sm:$0xff] %v265_v52  ;;  %274 = vst [vmem:[#allocation8 + $0x38] sm:$0xff] %v266_v53 }
 0x219   :  { %368 = shalt.err (!%p365_p6)
}
 0x21a   :  { %s369_s15 = scalar_lea.hbm %s494_s3, 1024 }
 0x21b   :  { %p370_p7 = scmp.ne.s32.totalorder %s494_s3, %s369_s15  ;;  %p373_p8 = scmp.lt.u32.totalorder %s369_s15, %s494_s3 }
 0x21d   :  { %p375_p9 = pnand %p373_p8, %p370_p7 }
 0x21f   :  { %378 = shalt.err (!%p375_p9)
}
 0x220   :  { %s392_s20 = smov 256   ;;  %s393_s21 = smov 16  }
 0x221   :  { %286 = dma.vmem_to_hbm [thread:$0]  %s281_s2, 1024, %s494_s3, [#allocation5], %s392_s20, %s392_s20, %s393_s21  }
 0x222   :  { %383 = dma.done.wait [#allocation5], 1024  }
 0x223   :  { %384 = vsyncadd [#allocation5], 4294966272 }
 0x224   :  { %290 = vsyncpa [#allocation4], 1 }
 0x225   :  { %291 = vsyncpa [#allocation7], 1 }
 0x226   :  { %292 = vsyncpa [#allocation5], 1 }

</bundles_post_ra>
